<compile_context>
chip_gen: v7x
topology: tpu7x:2x2x1
jax: 0.10.0
libtpu: 0.0.40
codegen_flags: <defaults>
</compile_context>

<pallas_src>
import functools

import jax
import jax.numpy as jnp
from jax.experimental import pallas as pl
from jax.experimental.pallas import tpu as pltpu


def _mlp_kernel(*refs, num_layers):
    # refs = (x_ref, w0, b0, w1, b1, ..., wo, bo, out_ref)
    x_ref = refs[0]
    out_ref = refs[-1]
    param_refs = refs[1:-1]

    h = x_ref[...]
    # hidden layers: Linear -> ReLU  (Dropout == identity in inference)
    for i in range(num_layers):
        w = param_refs[2 * i][...]
        b = param_refs[2 * i + 1][...]
        h = jnp.maximum(
            jnp.dot(h, w, preferred_element_type=jnp.float32) + b, 0.0)
    # output layer: Linear (no activation); narrow store (masked vst) is a
    # VMEM-side cost, negligible vs. the HBM saving of not lane-padding.
    wo = param_refs[2 * num_layers][...]
    bo = param_refs[2 * num_layers + 1][...]
    out = jnp.dot(h, wo, preferred_element_type=jnp.float32) + bo
    out_ref[...] = out.astype(out_ref.dtype)
    # TODO(synk): training-mode dropout (pltpu.prng_seed / prng_random_bits
    # masking) not implemented; nn.Dropout is identity in inference forward.


def _round_up(v, m):
    return ((v + m - 1) // m) * m


_LANES = 128
_VMEM_BUDGET = 48 * 1024 * 1024  # scoped-VMEM cap, safe on v5e/v6e/v7x


def _choose_block_m(M, block_m, input_dim, hidden_dim, output_dim,
                    itemsize, param_vmem_bytes):
    """Pick the row tile: big enough to amortize per-step overhead, small
    enough to fit the scoped VMEM budget, and split for megacore when the
    batch is large."""
    bm = min(block_m, _round_up(M, 8))
    bm = max(8, _round_up(bm, 8))
    # Prefer >= 2 blocks for megacore sharding when the batch is big enough.
    if M >= 4096 and pl.cdiv(M, bm) < 2:
        bm = _round_up(pl.cdiv(M, 2), 8)
    # Per-row VMEM cost with 128-lane-padded tiles: double-buffered x and out
    # plus ~3 f32 hidden-width intermediates.
    per_row = (2 * _round_up(input_dim, _LANES) * itemsize
               + 2 * _round_up(output_dim, _LANES) * itemsize
               + 3 * _round_up(hidden_dim, _LANES) * 4)
    bm_cap = (_VMEM_BUDGET - param_vmem_bytes) // per_row
    bm_cap = max(8, (bm_cap // 8) * 8)
    return min(bm, bm_cap)


def rl_model_forward(x, params, *, input_dim, hidden_dim, output_dim,
                     num_layers=2, block_m=8192):
    """params: list [(W0, b0), (W1, b1), ..., (Wo, bo)] with W as [in, out]."""
    # Flatten everything but the feature dim, mirroring x.view(-1, input_dim).
    x2d = x.reshape(-1, input_dim)
    M = x2d.shape[0]
    dtype = x2d.dtype
    itemsize = dtype.itemsize

    flat_params = []
    for (w, b) in params:
        flat_params.append(w)
        flat_params.append(b.reshape(1, -1))

    # Rough VMEM footprint of the resident params (lane/sublane padded).
    param_vmem_bytes = sum(
        _round_up(p.shape[-1], _LANES) * _round_up(p.shape[0], 8)
        * p.dtype.itemsize for p in flat_params)

    bm = _choose_block_m(M, block_m, input_dim, hidden_dim, output_dim,
                         itemsize, param_vmem_bytes)
    n_blocks = pl.cdiv(M, bm)

    grid = (n_blocks,)
    x_spec = pl.BlockSpec((bm, input_dim), lambda i: (i, 0))
    out_spec = pl.BlockSpec((bm, output_dim), lambda i: (i, 0))
    # Small params: keep them fully VMEM-resident (no per-step pipelining).
    param_specs = [pl.BlockSpec(memory_space=pltpu.MemorySpace.VMEM)
                   for _ in flat_params]

    # Advisory cost estimate (memory-bound kernel) with de-padded traffic.
    flops = 2 * M * (input_dim * hidden_dim
                     + max(num_layers - 1, 0) * hidden_dim * hidden_dim
                     + hidden_dim * output_dim)
    param_bytes = sum(int(p.size) * p.dtype.itemsize for p in flat_params)
    bytes_accessed = (M * input_dim * itemsize
                      + M * output_dim * itemsize
                      + param_bytes)

    kernel = functools.partial(_mlp_kernel, num_layers=num_layers)

    out = pl.pallas_call(
        kernel,
        out_shape=jax.ShapeDtypeStruct((M, output_dim), dtype),
        grid_spec=pltpu.PrefetchScalarGridSpec(
            num_scalar_prefetch=0,
            grid=grid,
            in_specs=[x_spec] + param_specs,
            out_specs=out_spec,
        ),
        compiler_params=pltpu.CompilerParams(
            dimension_semantics=("parallel",),
            vmem_limit_bytes=_VMEM_BUDGET),
        cost_estimate=pl.CostEstimate(
            flops=int(flops),
            transcendentals=0,
            bytes_accessed=int(bytes_accessed)),
    )(x2d, *flat_params)

    return out


def init_params(key, input_dim, hidden_dim, output_dim, num_layers=2):
    """Deterministic init matching nn.Linear shapes (stored as [in, out])."""
    params = []
    dims = [input_dim] + [hidden_dim] * num_layers
    for i in range(num_layers):
        key, kw, kb = jax.random.split(key, 3)
        fan_in = dims[i]
        bound = 1.0 / jnp.sqrt(fan_in)
        w = jax.random.uniform(kw, (dims[i], dims[i + 1]), jnp.float32, -bound, bound)
        b = jax.random.uniform(kb, (dims[i + 1],), jnp.float32, -bound, bound)
        params.append((w, b))
    key, kw, kb = jax.random.split(key, 3)
    bound = 1.0 / jnp.sqrt(hidden_dim)
    wo = jax.random.uniform(kw, (hidden_dim, output_dim), jnp.float32, -bound, bound)
    bo = jax.random.uniform(kb, (output_dim,), jnp.float32, -bound, bound)
    params.append((wo, bo))
    return params


def reference_forward(x, params, input_dim):
    h = x.reshape(-1, input_dim).astype(jnp.float32)
    for (w, b) in params[:-1]:
        h = jnp.maximum(h @ w + b, 0.0)
    wo, bo = params[-1]
    return h @ wo + bo


if __name__ == "__main__":
    input_dim, hidden_dim, output_dim, num_layers = 16, 32, 4, 2
    batch = 10  # deliberately not a multiple of 8 to exercise the ragged tail

    key = jax.random.PRNGKey(0)
    key, kx = jax.random.split(key)
    x = jax.random.normal(kx, (batch, input_dim), jnp.float32)

    params = init_params(key, input_dim, hidden_dim, output_dim, num_layers)

    out = rl_model_forward(
        x, params,
        input_dim=input_dim, hidden_dim=hidden_dim, output_dim=output_dim,
        num_layers=num_layers, block_m=8192)
    out = jax.block_until_ready(out)

    ref = reference_forward(x, params, input_dim)
    assert out.shape == (batch, output_dim), out.shape
    assert jnp.allclose(out, ref, atol=1e-5, rtol=1e-5), "mismatch vs reference"

    print("KERNEL_OK")
</pallas_src>

<mosaic_0001>
module attributes {stable_mosaic.version = 11 : i64} {
  func.func @_mlp_kernel(%arg0: i32, %arg1: memref<16x16xf32, #tpu.memory_space<vmem>>, %arg2: memref<16x32xf32, #tpu.memory_space<vmem>>, %arg3: memref<1x32xf32, #tpu.memory_space<vmem>>, %arg4: memref<32x32xf32, #tpu.memory_space<vmem>>, %arg5: memref<1x32xf32, #tpu.memory_space<vmem>>, %arg6: memref<32x4xf32, #tpu.memory_space<vmem>>, %arg7: memref<1x4xf32, #tpu.memory_space<vmem>>, %arg8: memref<16x4xf32, #tpu.memory_space<vmem>>) attributes {dimension_semantics = [#tpu.dimension_semantics<parallel>], iteration_bounds = array<i64: 1>, scalar_prefetch = 0 : i64, scratch_operands = 0 : i64, tpu.core_type = #tpu.core_type<tc>, window_params = [{transform_indices = @transform_0, window_bounds = array<i64: 16, 16>}, {pipeline_mode = #tpu.pipeline_mode<synchronous>, transform_indices = @transform_1, window_bounds = array<i64: 16, 32>}, {pipeline_mode = #tpu.pipeline_mode<synchronous>, transform_indices = @transform_2, window_bounds = array<i64: 1, 32>}, {pipeline_mode = #tpu.pipeline_mode<synchronous>, transform_indices = @transform_3, window_bounds = array<i64: 32, 32>}, {pipeline_mode = #tpu.pipeline_mode<synchronous>, transform_indices = @transform_4, window_bounds = array<i64: 1, 32>}, {pipeline_mode = #tpu.pipeline_mode<synchronous>, transform_indices = @transform_5, window_bounds = array<i64: 32, 4>}, {pipeline_mode = #tpu.pipeline_mode<synchronous>, transform_indices = @transform_6, window_bounds = array<i64: 1, 4>}, {transform_indices = @transform_7, window_bounds = array<i64: 16, 4>}]} {
    %c0 = arith.constant 0 : index
    %c0_0 = arith.constant 0 : index
    %0 = vector.load %arg1[%c0, %c0_0] : memref<16x16xf32, #tpu.memory_space<vmem>>, vector<16x16xf32>
    %c0_1 = arith.constant 0 : index
    %c0_2 = arith.constant 0 : index
    %1 = vector.load %arg2[%c0_1, %c0_2] : memref<16x32xf32, #tpu.memory_space<vmem>>, vector<16x32xf32>
    %c0_3 = arith.constant 0 : index
    %c0_4 = arith.constant 0 : index
    %2 = vector.load %arg3[%c0_3, %c0_4] : memref<1x32xf32, #tpu.memory_space<vmem>>, vector<1x32xf32>
    %cst = arith.constant dense<0.000000e+00> : vector<16x32xf32>
    %3 = tpu.matmul %0, %1, %cst {dimension_numbers = #tpu.dot_dimension_numbers<[1], [0], [0], [1], [0, 0, 1, 1], [], []>} : vector<16x16xf32>, vector<16x32xf32>, vector<16x32xf32> -> vector<16x32xf32>
    %4 = vector.broadcast %2 : vector<1x32xf32> to vector<16x32xf32>
    %5 = arith.addf %3, %4 : vector<16x32xf32>
    %cst_5 = arith.constant 0.000000e+00 : f32
    %6 = vector.broadcast %cst_5 : f32 to vector<16x32xf32>
    %7 = arith.maximumf %5, %6 : vector<16x32xf32>
    %c0_6 = arith.constant 0 : index
    %c0_7 = arith.constant 0 : index
    %8 = vector.load %arg4[%c0_6, %c0_7] : memref<32x32xf32, #tpu.memory_space<vmem>>, vector<32x32xf32>
    %c0_8 = arith.constant 0 : index
    %c0_9 = arith.constant 0 : index
    %9 = vector.load %arg5[%c0_8, %c0_9] : memref<1x32xf32, #tpu.memory_space<vmem>>, vector<1x32xf32>
    %cst_10 = arith.constant dense<0.000000e+00> : vector<16x32xf32>
    %10 = tpu.matmul %7, %8, %cst_10 {dimension_numbers = #tpu.dot_dimension_numbers<[1], [0], [0], [1], [0, 0, 1, 1], [], []>} : vector<16x32xf32>, vector<32x32xf32>, vector<16x32xf32> -> vector<16x32xf32>
    %11 = vector.broadcast %9 : vector<1x32xf32> to vector<16x32xf32>
    %12 = arith.addf %10, %11 : vector<16x32xf32>
    %cst_11 = arith.constant 0.000000e+00 : f32
    %13 = vector.broadcast %cst_11 : f32 to vector<16x32xf32>
    %14 = arith.maximumf %12, %13 : vector<16x32xf32>
    %c0_12 = arith.constant 0 : index
    %c0_13 = arith.constant 0 : index
    %15 = vector.load %arg6[%c0_12, %c0_13] : memref<32x4xf32, #tpu.memory_space<vmem>>, vector<32x4xf32>
    %c0_14 = arith.constant 0 : index
    %c0_15 = arith.constant 0 : index
    %16 = vector.load %arg7[%c0_14, %c0_15] : memref<1x4xf32, #tpu.memory_space<vmem>>, vector<1x4xf32>
    %cst_16 = arith.constant dense<0.000000e+00> : vector<16x4xf32>
    %17 = tpu.matmul %14, %15, %cst_16 {dimension_numbers = #tpu.dot_dimension_numbers<[1], [0], [0], [1], [0, 0, 1, 1], [], []>} : vector<16x32xf32>, vector<32x4xf32>, vector<16x4xf32> -> vector<16x4xf32>
    %18 = vector.broadcast %16 : vector<1x4xf32> to vector<16x4xf32>
    %19 = arith.addf %17, %18 : vector<16x4xf32>
    %c0_17 = arith.constant 0 : index
    %c0_18 = arith.constant 0 : index
    %20 = vector.load %arg8[%c0_17, %c0_18] : memref<16x4xf32, #tpu.memory_space<vmem>>, vector<16x4xf32>
    tpu.vector_store %arg8[%c0_17, %c0_18], %19 {strides = array<i32>} : memref<16x4xf32, #tpu.memory_space<vmem>>, vector<16x4xf32>,
    return
  }
  func.func @transform_0(%arg0: i32) -> (i32, i32) {
    %c0_i32 = arith.constant 0 : i32
    %c0_i32_0 = arith.constant 0 : i32
    return %arg0, %c0_i32 : i32, i32
  }
  func.func @transform_1(%arg0: i32) -> (i32, i32) {
    %c0_i32 = arith.constant 0 : i32
    %c0_i32_0 = arith.constant 0 : i32
    %c0_i32_1 = arith.constant 0 : i32
    return %c0_i32, %c0_i32_0 : i32, i32
  }
  func.func @transform_2(%arg0: i32) -> (i32, i32) {
    %c0_i32 = arith.constant 0 : i32
    %c0_i32_0 = arith.constant 0 : i32
    %c0_i32_1 = arith.constant 0 : i32
    return %c0_i32, %c0_i32_0 : i32, i32
  }
  func.func @transform_3(%arg0: i32) -> (i32, i32) {
    %c0_i32 = arith.constant 0 : i32
    %c0_i32_0 = arith.constant 0 : i32
    %c0_i32_1 = arith.constant 0 : i32
    return %c0_i32, %c0_i32_0 : i32, i32
  }
  func.func @transform_4(%arg0: i32) -> (i32, i32) {
    %c0_i32 = arith.constant 0 : i32
    %c0_i32_0 = arith.constant 0 : i32
    %c0_i32_1 = arith.constant 0 : i32
    return %c0_i32, %c0_i32_0 : i32, i32
  }
  func.func @transform_5(%arg0: i32) -> (i32, i32) {
    %c0_i32 = arith.constant 0 : i32
    %c0_i32_0 = arith.constant 0 : i32
    %c0_i32_1 = arith.constant 0 : i32
    return %c0_i32, %c0_i32_0 : i32, i32
  }
  func.func @transform_6(%arg0: i32) -> (i32, i32) {
    %c0_i32 = arith.constant 0 : i32
    %c0_i32_0 = arith.constant 0 : i32
    %c0_i32_1 = arith.constant 0 : i32
    return %c0_i32, %c0_i32_0 : i32, i32
  }
  func.func @transform_7(%arg0: i32) -> (i32, i32) {
    %c0_i32 = arith.constant 0 : i32
    %c0_i32_0 = arith.constant 0 : i32
    return %arg0, %c0_i32 : i32, i32
  }
}

</mosaic_0001>

<bundles_post_ra>
// kernel: tpu_custom_call.1
= control target key start
LH: loop header
LB: loop body
LE: loop exit
PB: predicated region body
PF: predicated region fallthrough
CT: control target
= control target key end

     0   :  { %12 = vsyncpa [#allocation3], 0  ;;  %s582_s0 = inlined_call_operand.hbm [shape: f32[10,16], index: 0, kind: input, shape index: {}]   ;;  %s583_s1 = inlined_call_operand.hbm [shape: f32[16,32], index: 1, kind: input, shape index: {}]   ;;  %s584_s2 = inlined_call_operand.vmem [shape: f32[1,32], index: 2, kind: input, shape index: {}]   ;;  %s585_s3 = inlined_call_operand.vmem [shape: f32[32,32], index: 3, kind: input, shape index: {}]   ;;  %s586_s4 = inlined_call_operand.vmem [shape: f32[1,32], index: 4, kind: input, shape index: {}]   ;;  %s587_s5 = inlined_call_operand.vmem [shape: f32[32,4], index: 5, kind: input, shape index: {}]   ;;  %s588_s6 = inlined_call_operand.vmem [shape: f32[1,4], index: 6, kind: input, shape index: {}]   ;;  %s589_s7 = inlined_call_operand.vmem [shape: f32[10,4], index: 7, kind: output, shape index: {}]  }
   0x1   :  { %13 = vsyncpa [#allocation5], 0  ;;  %s471_s24 = smov [#allocation2]   ;;  %s423_s28 = scalar_lea.hbm %s582_s0, 256 }
   0x2   :  { %s19_s25 = sshll.u32 %s471_s24, 4  ;;  %p424_p0 = scmp.ne.s32.totalorder %s582_s0, %s423_s28  ;;  %s20_s25 = int_to_ptr.vmem [resolvable:$true] %s19_s25 }
   0x3   :  { %p427_p1 = scmp.lt.u32.totalorder %s423_s28, %s582_s0 }
   0x5   :  { %p429_p2 = pnand %p427_p1, %p424_p0 }
   0x7   :  { %432 = shalt.err (!%p429_p2)
}
   0x8   :  { %s433_s10 = scalar_lea.vmem %s20_s25, 256  ;;  %p438_p4 = scmp.lt.s32.totalorder %s20_s25, %s20_s25 }
   0x9   :  { %p434_p3 = scmp.ne.s32.totalorder %s20_s25, %s433_s10  ;;  %p439_p5 = scmp.lt.s32.totalorder %s433_s10, %s433_s10 }
   0xb   :  { %p440_p6 = por %p439_p5, %p438_p4 }
   0xd   :  { %p441_p7 = pnand %p440_p6, %p434_p3 }
   0xf   :  { %444 = shalt.err (!%p441_p7)
}
  0x10   :  { %s472_s11 = smov 128   ;;  %s473_s12 = smov 8  }
  0x11   :  { %25 = dma.hbm_to_vmem [thread:$0]  %s582_s0, 256, %s20_s25, [#allocation3], %s472_s11, %s472_s11, %s473_s12  }
  0x12   :  { %s474_s15 = smov [#allocation4]   ;;  %s445_s19 = scalar_lea.hbm %s583_s1, 256 }
  0x13   :  { %s31_s16 = sshll.u32 %s474_s15, 4  ;;  %p446_p8 = scmp.ne.s32.totalorder %s583_s1, %s445_s19  ;;  %s32_s16 = int_to_ptr.vmem [resolvable:$true] %s31_s16 }
  0x14   :  { %p449_p9 = scmp.lt.u32.totalorder %s445_s19, %s583_s1 }
  0x16   :  { %p451_p10 = pnand %p449_p9, %p446_p8 }
  0x18   :  { %454 = shalt.err (!%p451_p10)
}
  0x19   :  { %s455_s24 = scalar_lea.vmem %s32_s16, 256  ;;  %p460_p12 = scmp.lt.s32.totalorder %s32_s16, %s32_s16 }
  0x1a   :  { %p456_p11 = scmp.ne.s32.totalorder %s32_s16, %s455_s24  ;;  %p461_p13 = scmp.lt.s32.totalorder %s455_s24, %s455_s24 }
  0x1c   :  { %p462_p0 = por %p461_p13, %p460_p12 }
  0x1e   :  { %p463_p1 = pnand %p462_p0, %p456_p11 }
  0x20   :  { %466 = shalt.err (!%p463_p1)
}
  0x21   :  { %37 = dma.hbm_to_vmem [thread:$0]  %s583_s1, 256, %s32_s16, [#allocation5], %s472_s11, %s472_s11, %s473_s12  }
  0x22   :  { %467 = dma.done.wait [#allocation3], 256  }
  0x23   :  { %468 = vsyncadd [#allocation3], 4294967040 }
  0x24   :  { %469 = dma.done.wait [#allocation5], 256  }
  0x25   :  { %470 = vsyncadd [#allocation5], 4294967040  ;;  %vm65_vm0 = vcmask 130048   ;;  %v56_v0 = vld [vmem:[#allocation4] sm:$0xff]  ;;  %v57_v1 = vld [vmem:[#allocation4 + $0x8] sm:$0xff]  ;;  %vm160_vm1 = vcmask 261120  }
  0x26   :  { %v54_v2 = vld [vmem:[#allocation2] sm:$0xff]  ;;  %v399_v3 = vpack.c.bf16 %v57_v1, %v56_v0  ;;  %v150_v5 = vld [vmem:[%s585_s3 + $0x8] sm:$0xff]  ;;  %v151_v8 = vld [vmem:[%s585_s3 + $0x10] sm:$0xff]  ;;  %vm336_vm2 = vcmask 31744  }
  0x27   :  { %374 = vmatprep.mubr.msk.f32.mxu0 %vm65_vm0, %v54_v2  ;;  %v149_v4 = vld [vmem:[%s585_s3] sm:$0xff]  ;;  %v55_v7 = vld [vmem:[#allocation2 + $0x8] sm:$0xff]  ;;  %v152_v9 = vld [vmem:[%s585_s3 + $0x18] sm:$0xff] }
  0x28   :  { %v403_v6 = vpack.c.bf16 %v150_v5, %v149_v4  ;;  %400 = vmatprep.subr.bf16.mxu0 %v399_v3  ;;  %v407_v10 = vpack.c.bf16 %v152_v9, %v151_v8  ;;  %v244_v11 = vld [vmem:[%s587_s5] sm:$0xff]  ;;  %v245_v12 = vld [vmem:[%s587_s5 + $0x8] sm:$0xff]  ;;  %v246_v21 = vld [vmem:[%s587_s5 + $0x10] sm:$0xff] }
  0x29   :  { %402 = vmatpush3.bf16.msra.mxu0 %v399_v3  ;;  %v411_v13 = vpack.c.bf16 %v245_v12, %v244_v11  ;;  %v345_v14 = vld [vmem:[%s584_s2] ss:$0 sm:$0xff]  ;;  %v247_v22 = vld [vmem:[%s587_s5 + $0x18] sm:$0xff] }
  0x2a   :  { %404 = vmatprep.subr.bf16.mxu1 %v403_v6  ;;  %v415_v23 = vpack.c.bf16 %v247_v22, %v246_v21  ;;  %v348_v24 = vld [vmem:[%s586_s4] ss:$0 sm:$0xff] }
  0x2b   :  { %406 = vmatpush3.bf16.msra.mxu1 %v403_v6  ;;  %412 = vmatprep.subr.bf16.mxu0 %v411_v13  ;;  %v351_v31 = vld [vmem:[%s588_s6] ss:$0 sm:$0xff] }
  0x2c   :  { %375 = vmatmul.mubr.msk.f32.vlgmr.msra.gmra.mrb[0].mxu0 %vm65_vm0, %v55_v7  ;;  %408 = vmatprep.subr.bf16.mxu1 %v407_v10 }
  0x2d   :  { %414 = vmatpush3.bf16.msra.mxu0 %v411_v13 }
  0x2e   :  { %416 = vmatprep.subr.bf16.mxu0 %v415_v23 }
  0x2f   :  { %410 = vmatpush3.bf16.msra.mxu1 %v407_v10 }
  0x31   :  { %418 = vmatpush3.bf16.msra.mxu0 %v415_v23 }
  0xff   :  { %v376_v15 = vpop.f32.mrb[0].mxu0 }
 0x100   :  { %v144_v16 = vadd.f32 %v376_v15, %v345_v14  ;;  %v138_v17 = vpop.f32.mrb[1].mxu0 }
 0x101   :  { %v139_v18 = vadd.f32 %v345_v14, %v138_v17 }
 0x102   :  { %v148_v20 = vmax.f32 %v144_v16, 0.0 }
 0x103   :  { %v147_v19 = vmax.f32 %v139_v18, 0.0 }
 0x105   :  { %385 = vmatprep.mubr.msk.f32.mxu1 %vm160_vm1, %v147_v19 }
 0x106   :  { %386 = vmatmul.mubr.msk.f32.vlgmr.msra.gmra.mrb[0].mxu1 %vm160_vm1, %v148_v20 }
 0x1d9   :  { %v387_v25 = vpop.f32.mrb[0].mxu1 }
 0x1da   :  { %v239_v26 = vadd.f32 %v387_v25, %v348_v24  ;;  %v233_v27 = vpop.f32.mrb[1].mxu1 }
 0x1db   :  { %v234_v28 = vadd.f32 %v348_v24, %v233_v27 }
 0x1dc   :  { %v243_v30 = vmax.f32 %v239_v26, 0.0 }
 0x1dd   :  { %v242_v29 = vmax.f32 %v234_v28, 0.0 }
 0x1df   :  { %396 = vmatprep.mubr.msk.f32.mxu0 %vm160_vm1, %v242_v29 }
 0x1e0   :  { %397 = vmatmul.mubr.msk.f32.vlgmr.msra.gmra.mrb[2].mxu0 %vm160_vm1, %v243_v30 }
 0x2b3   :  { %v398_v32 = vpop.f32.mrb[2].mxu0 }
 0x2b4   :  { %v333_v33 = vadd.f32 %v398_v32, %v351_v31  ;;  %v327_v34 = vpop.f32.mrb[3].mxu0 }
 0x2b5   :  { %v328_v35 = vadd.f32 %v351_v31, %v327_v34 }
 0x2b6   :  { %338 = vst.msk [vmem:[%s589_s7 + $0x8] sm:$0xff] %vm336_vm2, %v333_v33 }
 0x2b7   :  { %337 = vst.msk [vmem:[%s589_s7] sm:$0xff] %vm336_vm2, %v328_v35 }
 0x2b8   :  { %343 = vsyncpa [#allocation3], 1 }
 0x2b9   :  { %344 = vsyncpa [#allocation5], 1 }

</bundles_post_ra>
